<compile_context>
chip_gen: v5e
topology: v5e:2x2
jax: 0.10.0
libtpu: 0.0.40
codegen_flags: <defaults>
</compile_context>

<pallas_src>
import functools
import math

import jax
import jax.numpy as jnp
from jax.experimental import pallas as pl
from jax.experimental.pallas import tpu as pltpu


# ------------------------------ Pallas kernels ------------------------------

def patch_proj_kernel(p_ref, w_ref, b_ref, o_ref):
    # p_ref: (T, P) bf16   w_ref: (P, D) bf16   b_ref: (1, D) f32   o_ref: (T, D) f32
    o_ref[...] = (
        jnp.dot(p_ref[...], w_ref[...], preferred_element_type=jnp.float32)
        + b_ref[...]
    )


def _blocks_kernel(x_ref, vec_ref, w1_ref, gw_ref, gb_ref, w2_ref,
                   fn_w_ref, fn_b_ref, hw_ref, hb_ref,
                   o_ref, tok_ref, *, Bt, N, D, C, C2):
    """Fused gMLP: one grid step == one (batch tile b, layer l).

    Tokens live in the VMEM scratch `tok_ref` for the whole layer loop.
    At l == L-1 the final LayerNorm + mean pool + head run in place and only
    (Bt, Kp) logits are written back to HBM.
    """
    l = pl.program_id(1)

    @pl.when(l == 0)
    def _():
        tok_ref[...] = x_ref[...]                       # load this batch tile's tokens

    x = tok_ref[...]                                    # (Bt, N, D) resident f32

    # Unpack the packed per-layer small vectors (single (1, V) streamed operand).
    vec = vec_ref[0]                                    # (1, V) f32
    off = 0
    ln_w = vec[:, off:off + D]; off += D
    ln_b = vec[:, off:off + D]; off += D
    b1 = vec[:, off:off + C]; off += C
    g_ln_w = vec[:, off:off + C2]; off += C2
    g_ln_b = vec[:, off:off + C2]; off += C2
    b2 = vec[:, off:off + D]; off += D

    # Block LayerNorm (eps = 1e-6), f32 elementwise math.
    mu = jnp.mean(x, axis=-1, keepdims=True)
    var = jnp.mean(jnp.square(x - mu), axis=-1, keepdims=True)
    y = (x - mu) * jax.lax.rsqrt(var + 1e-6) * ln_w + ln_b

    # GatedMlp fc1 (u|v merged into one (D, C) weight); batch rows folded into M.
    y2 = y.reshape(Bt * N, D)
    h = jnp.dot(y2.astype(jnp.bfloat16), w1_ref[0],
                preferred_element_type=jnp.float32) + b1
    # nn.GELU() default is exact erf -> keep exact f32 erf for parity.
    # TODO(synk): jax.nn.gelu(..., approximate=True) would route to the EUP and
    # free the VALU, but changes numerics vs the PyTorch reference.
    h = jax.nn.gelu(h, approximate=False)
    u = h[:, :C2].reshape(Bt, N, C2)
    v = h[:, C2:].reshape(Bt, N, C2)

    # SpatialGatingUnit: LayerNorm (default eps = 1e-5) + projection over seq dim.
    mv = jnp.mean(v, axis=-1, keepdims=True)
    vv = jnp.mean(jnp.square(v - mv), axis=-1, keepdims=True)
    vn = (v - mv) * jax.lax.rsqrt(vv + 1e-5) * g_ln_w + g_ln_b

    # v_new[b, n, c] = sum_m W[n, m] * v[b, m, c] + bias[n]
    # Single shared-weight matmul (one wide MXU pass, no broadcast of W).
    vn_b = vn.astype(jnp.bfloat16)
    if Bt == 1:
        vp = jnp.dot(gw_ref[0], vn_b.reshape(N, C2),
                     preferred_element_type=jnp.float32)
        vp = vp.reshape(1, N, C2) + gb_ref[0]
    else:
        vn_t = jnp.swapaxes(vn_b, 0, 1).reshape(N, Bt * C2)        # (N, Bt*C2)
        vp = jnp.dot(gw_ref[0], vn_t, preferred_element_type=jnp.float32)
        vp = jnp.swapaxes(vp.reshape(N, Bt, C2), 0, 1) + gb_ref[0]  # non-lane transpose

    gated = (u * vp).reshape(Bt * N, C2)
    out = jnp.dot(gated.astype(jnp.bfloat16), w2_ref[0],
                  preferred_element_type=jnp.float32) + b2

    # Reference: x = self.norm(x); x = x + mlp_channels(x)  -> residual on the
    # *normalized* tokens.
    new_tok = y + out.reshape(Bt, N, D)
    tok_ref[...] = new_tok

    @pl.when(l == pl.num_programs(1) - 1)
    def _():
        # Final LayerNorm (eps = 1e-6) + global mean pool + classifier head,
        # fused so the (B, N, D) token tensor never round-trips through HBM.
        mu2 = jnp.mean(new_tok, axis=-1, keepdims=True)
        var2 = jnp.mean(jnp.square(new_tok - mu2), axis=-1, keepdims=True)
        yn = (new_tok - mu2) * jax.lax.rsqrt(var2 + 1e-6) * fn_w_ref[...] + fn_b_ref[...]
        pooled = jnp.mean(yn, axis=1)                   # (Bt, D)
        o_ref[0] = (jnp.dot(pooled.astype(jnp.bfloat16), hw_ref[...],
                            preferred_element_type=jnp.float32) + hb_ref[...])


# ------------------------------ sizing helpers ------------------------------

def _blocks_vmem_estimate(Bt, N, D, C, C2, V, Kp):
    """Rough VMEM footprint (bytes) of one grid step of the fused blocks kernel."""
    f4, b2 = 4, 2
    layer_stream = 2 * ((D * C + C2 * D + N * N) * b2 + V * f4 + N * 128 * f4)
    tok_io = 2 * Bt * N * D * f4                  # double-buffered token input block
    out_io = 2 * Bt * Kp * f4
    scratch = Bt * N * D * f4                     # resident token accumulator
    consts = 2 * D * f4 + D * Kp * b2 + Kp * f4   # final norm + head (fetched once)
    inter = Bt * N * (C + 4 * C2) * f4            # live f32 intermediates h/u/v/vn/vp
    return layer_stream + tok_io + out_io + scratch + consts + inter


def _pick_bt(B, N, D, C, C2, V, Kp, budget=40 * (1 << 20)):
    """Largest batch tile s.t. Bt*N <= 1024 MXU rows, nb >= 2 when B >= 2
    (v7x has 2 TensorCores sharing the 'parallel' axis), and the explicit VMEM
    budget stays inside v7x's 64 MiB physical VMEM (v5e/v6e have 128 MiB)."""
    best = 1
    for cand in range(1, B + 1):
        if B % cand:
            continue
        if B >= 2 and B // cand < 2:
            continue
        if cand * N > 1024:
            continue
        if _blocks_vmem_estimate(cand, N, D, C, C2, V, Kp) > budget:
            continue
        best = cand
    return best


# ------------------------------ wrappers ------------------------------

def patch_embed(x, w_p, b_p, patch):
    """Conv2d(k=stride=patch) == per-patch linear projection (reshape glue + matmul)."""
    B, Cin, H, W = x.shape
    gh, gw = H // patch, W // patch
    N = gh * gw
    P, D = w_p.shape
    patches = x.reshape(B, Cin, gh, patch, gw, patch)
    patches = patches.transpose(0, 2, 4, 1, 3, 5).reshape(B * N, P)

    rows = B * N
    if rows > 512:
        tile = 512                                   # ~85% of HBM roofline already
        padded = pl.cdiv(rows, tile) * tile
        if padded != rows:                           # padded tail instead of one huge block
            patches = jnp.pad(patches, ((0, padded - rows), (0, 0)))
    else:
        tile = rows
        padded = rows
    grid = padded // tile

    out = pl.pallas_call(
        patch_proj_kernel,
        out_shape=jax.ShapeDtypeStruct((padded, D), jnp.float32),
        grid=(grid,),
        in_specs=[
            pl.BlockSpec((tile, P), lambda i: (i, 0)),
            pl.BlockSpec((P, D), lambda i: (0, 0)),
            pl.BlockSpec((1, D), lambda i: (0, 0)),
        ],
        out_specs=pl.BlockSpec((tile, D), lambda i: (i, 0)),
        compiler_params=pltpu.CompilerParams(dimension_semantics=("parallel",)),
    )(patches.astype(jnp.bfloat16), w_p, b_p)
    return out[:rows].reshape(B, N, D)


def run_blocks_head(tokens, blocks, norm_w, norm_b, head_w, head_b):
    """All SpatialGatingBlocks + final LN + pool + head in one pallas_call."""
    B, N, D = tokens.shape
    L, _, C = blocks["w1"].shape
    C2 = C // 2
    V = blocks["vec"].shape[-1]
    Kp = head_w.shape[1]

    Bt = _pick_bt(B, N, D, C, C2, V, Kp)
    nb = B // Bt

    est = _blocks_vmem_estimate(Bt, N, D, C, C2, V, Kp)
    # Explicit scoped-VMEM limit: v5e default is only 16 MiB; keep <= 56 MiB so
    # v7x (64 MiB physical) retains headroom.
    vmem_limit = int(min(56 * (1 << 20), max(32 * (1 << 20), est * 3 // 2)))

    kernel = functools.partial(_blocks_kernel, Bt=Bt, N=N, D=D, C=C, C2=C2)

    grid_spec = pltpu.PrefetchScalarGridSpec(
        num_scalar_prefetch=0,
        grid=(nb, L),
        in_specs=[
            pl.BlockSpec((Bt, N, D), lambda b, l: (b, 0, 0)),    # tokens
            pl.BlockSpec((1, 1, V), lambda b, l: (l, 0, 0)),     # packed LN/bias vecs
            pl.BlockSpec((1, D, C), lambda b, l: (l, 0, 0)),     # fc1 weight (u|v merged)
            pl.BlockSpec((1, N, N), lambda b, l: (l, 0, 0)),     # SGU spatial weight
            pl.BlockSpec((1, N, 1), lambda b, l: (l, 0, 0)),     # SGU spatial bias
            pl.BlockSpec((1, C2, D), lambda b, l: (l, 0, 0)),    # fc2 weight
            pl.BlockSpec((1, D), lambda b, l: (0, 0)),           # final norm w (constant)
            pl.BlockSpec((1, D), lambda b, l: (0, 0)),           # final norm b (constant)
            pl.BlockSpec((D, Kp), lambda b, l: (0, 0)),          # head weight (constant)
            pl.BlockSpec((1, Kp), lambda b, l: (0, 0)),          # head bias (constant)
        ],
        out_specs=pl.BlockSpec((1, Bt, Kp), lambda b, l: (b, 0, 0)),
        scratch_shapes=[pltpu.VMEM((Bt, N, D), jnp.float32)],    # resident tokens
    )

    logits = pl.pallas_call(
        kernel,
        out_shape=jax.ShapeDtypeStruct((nb, Bt, Kp), jnp.float32),
        grid_spec=grid_spec,
        compiler_params=pltpu.CompilerParams(
            dimension_semantics=("parallel", "arbitrary"),
            vmem_limit_bytes=vmem_limit),
    )(tokens, blocks["vec"], blocks["w1"], blocks["g_w"], blocks["g_b"],
      blocks["w2"], norm_w, norm_b, head_w, head_b)
    return logits.reshape(B, Kp)


def gmlp_forward(x, params, *, patch, num_classes):
    tokens = patch_embed(x, params["stem_w"], params["stem_b"], patch)
    logits = run_blocks_head(tokens, params["blocks"],
                             params["norm_w"], params["norm_b"],
                             params["head_w"], params["head_b"])
    return logits[:, :num_classes]                  # drop lane padding of the head


# ------------------------------ parameter init ------------------------------

def _xavier_uniform(key, fan_in, fan_out, shape):
    bound = math.sqrt(6.0 / (fan_in + fan_out))
    return jax.random.uniform(key, shape, jnp.float32, -bound, bound)


def init_params(key, *, in_chans, patch, seq_len, embed_dim, mlp_ratio,
                num_blocks, num_classes):
    D = embed_dim
    C = int(D * mlp_ratio)
    C2 = C // 2
    P = in_chans * patch * patch
    N = seq_len
    L = num_blocks

    keys = jax.random.split(key, 1 + 5 * L)
    ki = iter(keys)

    # Stem conv (lecun normal, fan_in = P).
    # TODO(synk): exact truncated-normal tail clipping of lecun_normal_ not reproduced.
    stem_w = jax.random.normal(next(ki), (P, D), jnp.float32) * math.sqrt(1.0 / P)
    stem_b = jnp.zeros((1, D), jnp.float32)

    vecs, w1s, g_ws, g_bs, w2s = [], [], [], [], []
    for _ in range(L):
        ln_w = jnp.ones((1, D), jnp.float32)
        ln_b = jnp.zeros((1, D), jnp.float32)
        w1 = _xavier_uniform(next(ki), D, C, (D, C))                 # fc1 (u|v merged)
        b1 = jax.random.normal(next(ki), (1, C), jnp.float32) * 1e-6
        g_ln_w = jnp.ones((1, C2), jnp.float32)
        g_ln_b = jnp.zeros((1, C2), jnp.float32)
        g_w = jax.random.normal(next(ki), (N, N), jnp.float32) * 1e-6
        g_b = jnp.ones((N, 1), jnp.float32)
        w2 = _xavier_uniform(next(ki), C2, D, (C2, D))
        b2 = jax.random.normal(next(ki), (1, D), jnp.float32) * 1e-6
        # Pack the small per-layer vectors into one lane-contiguous operand:
        # [ln_w | ln_b | b1 | g_ln_w | g_ln_b | b2]  -> (1, 3D + 2C)
        vecs.append(jnp.concatenate([ln_w, ln_b, b1, g_ln_w, g_ln_b, b2], axis=-1))
        w1s.append(w1); g_ws.append(g_w); g_bs.append(g_b); w2s.append(w2)

    blocks = dict(
        vec=jnp.stack(vecs),                                 # (L, 1, 3D+2C) f32
        w1=jnp.stack(w1s).astype(jnp.bfloat16),              # (L, D, C)   MXU bf16
        g_w=jnp.stack(g_ws).astype(jnp.bfloat16),            # (L, N, N)   MXU bf16
        g_b=jnp.stack(g_bs),                                 # (L, N, 1)   f32
        w2=jnp.stack(w2s).astype(jnp.bfloat16),              # (L, C2, D)  MXU bf16
    )

    Kp = max(128, ((num_classes + 127) // 128) * 128)        # lane-dense classifier
    return dict(
        stem_w=stem_w.astype(jnp.bfloat16), stem_b=stem_b,
        blocks=blocks,
        norm_w=jnp.ones((1, D), jnp.float32),
        norm_b=jnp.zeros((1, D), jnp.float32),
        head_w=jnp.zeros((D, Kp), jnp.bfloat16),             # head init: zeros (spec)
        head_b=jnp.zeros((1, Kp), jnp.float32),
    )


# ------------------------------ main ------------------------------

if __name__ == "__main__":
    # Small config with D / C / C2 multiples of 128 so every tile is lane-dense.
    B, in_chans, img, patch = 2, 3, 16, 4
    embed_dim, mlp_ratio, num_blocks, num_classes = 128, 4, 2, 10
    seq_len = (img // patch) ** 2                            # 16 tokens

    key = jax.random.PRNGKey(0)
    pkey, xkey = jax.random.split(key)
    params = init_params(pkey, in_chans=in_chans, patch=patch, seq_len=seq_len,
                         embed_dim=embed_dim, mlp_ratio=mlp_ratio,
                         num_blocks=num_blocks, num_classes=num_classes)

    x = jax.random.normal(xkey, (B, in_chans, img, img), jnp.float32)

    logits = gmlp_forward(x, params, patch=patch, num_classes=num_classes)
    jax.block_until_ready(logits)
    assert logits.shape == (B, num_classes)
    assert bool(jnp.all(jnp.isfinite(logits)))
    print("KERNEL_OK")
</pallas_src>

<mosaic_0001>
module attributes {stable_mosaic.version = 11 : i64} {
  func.func @patch_proj_kernel(%arg0: i32, %arg1: memref<32x48xbf16, #tpu.memory_space<vmem>>, %arg2: memref<48x128xbf16, #tpu.memory_space<vmem>>, %arg3: memref<1x128xf32, #tpu.memory_space<vmem>>, %arg4: memref<32x128xf32, #tpu.memory_space<vmem>>) attributes {dimension_semantics = [#tpu.dimension_semantics<parallel>], iteration_bounds = array<i64: 1>, scalar_prefetch = 0 : i64, scratch_operands = 0 : i64, tpu.core_type = #tpu.core_type<tc>, window_params = [{transform_indices = @transform_0, window_bounds = array<i64: 32, 48>}, {pipeline_mode = #tpu.pipeline_mode<synchronous>, transform_indices = @transform_1, window_bounds = array<i64: 48, 128>}, {pipeline_mode = #tpu.pipeline_mode<synchronous>, transform_indices = @transform_2, window_bounds = array<i64: 1, 128>}, {transform_indices = @transform_3, window_bounds = array<i64: 32, 128>}]} {
    %c0 = arith.constant 0 : index
    %c0_0 = arith.constant 0 : index
    %0 = vector.load %arg1[%c0, %c0_0] : memref<32x48xbf16, #tpu.memory_space<vmem>>, vector<32x48xbf16>
    %c0_1 = arith.constant 0 : index
    %c0_2 = arith.constant 0 : index
    %1 = vector.load %arg2[%c0_1, %c0_2] : memref<48x128xbf16, #tpu.memory_space<vmem>>, vector<48x128xbf16>
    %cst = arith.constant dense<0.000000e+00> : vector<32x128xf32>
    %2 = tpu.matmul %0, %1, %cst {dimension_numbers = #tpu.dot_dimension_numbers<[1], [0], [0], [1], [0, 0, 1, 1], [], []>} : vector<32x48xbf16>, vector<48x128xbf16>, vector<32x128xf32> -> vector<32x128xf32>
    %c0_3 = arith.constant 0 : index
    %c0_4 = arith.constant 0 : index
    %3 = vector.load %arg3[%c0_3, %c0_4] : memref<1x128xf32, #tpu.memory_space<vmem>>, vector<1x128xf32>
    %4 = vector.broadcast %3 : vector<1x128xf32> to vector<32x128xf32>
    %5 = arith.addf %2, %4 : vector<32x128xf32>
    %c0_5 = arith.constant 0 : index
    %c0_6 = arith.constant 0 : index
    %6 = vector.load %arg4[%c0_5, %c0_6] : memref<32x128xf32, #tpu.memory_space<vmem>>, vector<32x128xf32>
    tpu.vector_store %arg4[%c0_5, %c0_6], %5 {strides = array<i32>} : memref<32x128xf32, #tpu.memory_space<vmem>>, vector<32x128xf32>,
    return
  }
  func.func @transform_0(%arg0: i32) -> (i32, i32) {
    %c0_i32 = arith.constant 0 : i32
    %c0_i32_0 = arith.constant 0 : i32
    return %arg0, %c0_i32 : i32, i32
  }
  func.func @transform_1(%arg0: i32) -> (i32, i32) {
    %c0_i32 = arith.constant 0 : i32
    %c0_i32_0 = arith.constant 0 : i32
    %c0_i32_1 = arith.constant 0 : i32
    return %c0_i32, %c0_i32_0 : i32, i32
  }
  func.func @transform_2(%arg0: i32) -> (i32, i32) {
    %c0_i32 = arith.constant 0 : i32
    %c0_i32_0 = arith.constant 0 : i32
    %c0_i32_1 = arith.constant 0 : i32
    return %c0_i32, %c0_i32_0 : i32, i32
  }
  func.func @transform_3(%arg0: i32) -> (i32, i32) {
    %c0_i32 = arith.constant 0 : i32
    %c0_i32_0 = arith.constant 0 : i32
    return %arg0, %c0_i32 : i32, i32
  }
}

</mosaic_0001>

<bundles_post_ra>
// kernel: tpu_custom_call.1
= control target key start
LH: loop header
LB: loop body
LE: loop exit
PB: predicated region body
PF: predicated region fallthrough
CT: control target
= control target key end

     0   :  { %8 = vsyncpa [#allocation3], 0  ;;  %s295_s0 = inlined_call_operand.hbm [shape: bf16[32,48], index: 0, kind: input, shape index: {}]   ;;  %s296_s1 = inlined_call_operand.hbm [shape: bf16[48,128], index: 1, kind: input, shape index: {}]   ;;  %s297_s2 = inlined_call_operand.vmem [shape: f32[1,128], index: 2, kind: input, shape index: {}]   ;;  %s298_s3 = inlined_call_operand.hbm [shape: f32[32,128], index: 3, kind: output, shape index: {}]  }
   0x1   :  { %9 = vsyncpa [#allocation6], 0 }
   0x2   :  { %10 = vsyncpa [#allocation4], 0  ;;  %s15_s14 = sshll.u32 %s295_s0, 4  ;;  %s256_s15 = smov [#allocation2]   ;;  %s16_s14 = int_to_ptr.hbm [resolvable:$true] %s15_s14 }
   0x3   :  { %s17_s16 = sshll.u32 %s256_s15, 4  ;;  %s28_s19 = sshll.u32 %s296_s1, 4  ;;  %s18_s16 = int_to_ptr.vmem [resolvable:$true] %s17_s16  ;;  %s29_s19 = int_to_ptr.hbm [resolvable:$true] %s28_s19 }
   0x4   :  { %s257_s20 = smov 64   ;;  %s258_s21 = smov 4  }
   0x5   :  { %23 = dma.hbm_to_vmem [thread:$0]  %s16_s14, 256, %s18_s16, [#allocation3], %s257_s20, %s257_s20, %s258_s21  }
   0x6   :  { %s259_s22 = smov [#allocation5]  }
   0x7   :  { %s30_s23 = sshll.u32 %s259_s22, 4  ;;  %s31_s23 = int_to_ptr.vmem [resolvable:$true] %s30_s23 }
   0x8   :  { %36 = dma.hbm_to_vmem [thread:$0]  %s29_s19, 384, %s31_s23, [#allocation6], %s257_s20, %s257_s20, %s258_s21  }
   0x9   :  { %250 = dma.done.wait [#allocation3], 256  }
   0xa   :  { %251 = vsyncadd [#allocation3], 4294967040 }
   0xb   :  { %252 = dma.done.wait [#allocation6], 384  }
   0xc   :  { %253 = vsyncadd [#allocation6], 4294966912  ;;  %v166_v0 = vld [vmem:[#allocation5 + $0x10] sm:$0xff]  ;;  %v165_v1 = vld [vmem:[#allocation5 + $0x8] sm:$0xff]  ;;  %vm90_vm0 = vcmask 392192   ;;  %s260_s24 = smov [#allocation7]  }
   0xd   :  { %102 = vmatpush.bf16.msra.mxu0 %v166_v0  ;;  %167 = vmatpush.bf16.msra.mxu1 %v166_v0  ;;  %v164_v2 = vld [vmem:[#allocation5] sm:$0xff]  ;;  %v162_v3 = vld [vmem:[#allocation2] sm:$0xff]  ;;  %v163_v4 = vld [vmem:[#allocation2 + $0x8] sm:$0xff]  ;;  %s124_s25 = sshll.u32 %s260_s24, 4  ;;  %s126_s28 = sshll.u32 %s298_s3, 4  ;;  %s125_s25 = int_to_ptr.vmem [resolvable:$true] %s124_s25  ;;  %s127_s28 = int_to_ptr.hbm [resolvable:$true] %s126_s28 }
   0xe   :  { %v177_v5 = vld [vmem:[%s297_s2] ss:$0 sm:$0xff]  ;;  %s261_s2 = smov 128   ;;  %s262_s29 = smov 8  }
  0x11   :  { %103 = vmatpush.bf16.msra.mxu0 %v165_v1  ;;  %168 = vmatpush.bf16.msra.mxu1 %v165_v1 }
  0x15   :  { %104 = vmatpush.bf16.msra.mxu0 %v164_v2  ;;  %169 = vmatpush.bf16.msra.mxu1 %v164_v2 }
  0x18   :  { %160 = vmatmul.msk.bf16.vlgmr.msra.gmra.mxu0 %vm90_vm0, %v162_v3  ;;  %161 = vmatmul.msk.bf16.vlgmr.msra.gmra.mxu1 %vm90_vm0, %v163_v4 }
  0x95   :  { %v106_v6 = vpop.f32.mrf.mxu0  ;;  %v111_v7 = vpop.f32.mrf.mxu1 }
  0x96   :  { %v107_v8 = vadd.f32 %v177_v5, %v106_v6  ;;  %v112_v9 = vadd.f32 %v177_v5, %v111_v7 }
  0x98   :  { %116 = vst [vmem:[#allocation7] sm:$0xff] %v107_v8 }
  0x99   :  { %118 = vst [vmem:[#allocation7 + $0x10] sm:$0xff] %v112_v9 }
  0x9d   :  { %v108_v10 = vpop.f32.mrf.mxu0  ;;  %v113_v11 = vpop.f32.mrf.mxu1 }
  0x9e   :  { %v109_v12 = vadd.f32 %v177_v5, %v108_v10  ;;  %v114_v13 = vadd.f32 %v177_v5, %v113_v11 }
  0xa0   :  { %117 = vst [vmem:[#allocation7 + $0x8] sm:$0xff] %v109_v12 }
  0xa1   :  { %119 = vst [vmem:[#allocation7 + $0x18] sm:$0xff] %v114_v13 }
  0xa2   :  { %132 = dma.vmem_to_hbm [thread:$0]  %s125_s25, 512, %s127_s28, [#allocation4], %s261_s2, %s261_s2, %s262_s29  }
  0xa3   :  { %254 = dma.done.wait [#allocation4], 512  }
  0xa4   :  { %255 = vsyncadd [#allocation4], 4294966784 }
  0xa5   :  { %137 = vsyncpa [#allocation3], 1 }
  0xa6   :  { %138 = vsyncpa [#allocation6], 1 }
  0xa7   :  { %139 = vsyncpa [#allocation4], 1 }

</bundles_post_ra>
